<compile_context>
chip_gen: v7x
topology: tpu7x:2x2x1
jax: 0.10.0
libtpu: 0.0.40
codegen_flags: <defaults>
</compile_context>

<pallas_src>
import jax
import jax.numpy as jnp
from jax.experimental import pallas as pl
from jax.experimental.pallas import tpu as pltpu

LANE = 128
SUBLANE = 8
SUBLANE_BF16 = 16  # bf16 packs 2 rows per 32-bit sublane


def _round_up(x, m):
    return (x + m - 1) // m * m


def _decoder_mlp_kernel(y_ref, w1_ref, b1_ref, w2_ref, b2_ref, out_ref):
    # hidden = relu(y @ W1 + b1)   -- bf16 MXU inputs, f32 accumulation
    h = jnp.dot(y_ref[...], w1_ref[...], preferred_element_type=jnp.float32)
    h = jnp.maximum(h + b1_ref[...], 0.0)            # (tm, Hp) + (1, Hp)
    # out = hidden @ W2 + b2  -- stored lane-dense at the logical width (784)
    o = jnp.dot(h.astype(jnp.bfloat16), w2_ref[...],
                preferred_element_type=jnp.float32)
    out_ref[...] = (o + b2_ref[...]).astype(out_ref.dtype)


def _prepare_params(w1, b1, w2, b2):
    """Pad the hidden dim to a lane multiple (300 -> 384); cast weights to bf16.
    w1: (nk, hidden), w2: (hidden, image_size) -- (in, out) layout.
    The padded hidden columns/rows are zero so they contribute nothing."""
    nk, hidden = w1.shape
    _, image_size = w2.shape
    hid_p = _round_up(hidden, LANE)

    w1p = jnp.pad(w1.astype(jnp.bfloat16), ((0, 0), (0, hid_p - hidden)))
    b1p = jnp.pad(b1.astype(jnp.float32), (0, hid_p - hidden)).reshape(1, hid_p)
    w2p = jnp.pad(w2.astype(jnp.bfloat16), ((0, hid_p - hidden), (0, 0)))
    b2p = b2.astype(jnp.float32).reshape(1, image_size)
    return w1p, b1p, w2p, b2p, hid_p, image_size


def decoder_forward(y, w1, b1, w2, b2, *, tm=512, out_dtype=jnp.float32):
    """y: (B, N, K) or (B, N*K). Returns (B, image_size) in `out_dtype`.

    Weights are in (in_features, out_features) layout: out = x @ W + b,
    equivalent to PyTorch's x @ W.T + b with W transposed once on host.
    """
    nk = w1.shape[0]
    y2 = y.reshape(-1, nk).astype(jnp.bfloat16)      # == y.view(-1, N*K)
    B = y2.shape[0]

    w1p, b1p, w2p, b2p, hid_p, image_size = _prepare_params(w1, b1, w2, b2)

    # Batch tiling. Granularity 16 keeps bf16 input blocks sublane-native;
    # a tiny batch collapses to a single full-array block (always legal).
    gran = SUBLANE if B <= SUBLANE else SUBLANE_BF16
    tm_eff = min(tm, _round_up(B, gran))
    # Guarantee >=2 grid steps when the batch allows it so v7x's second
    # TensorCore gets work via the "parallel" batch axis.
    if B > gran and pl.cdiv(B, tm_eff) < 2:
        tm_eff = _round_up(pl.cdiv(B, 2), gran)

    grid_m = pl.cdiv(B, tm_eff)
    B_pad = grid_m * tm_eff
    if B_pad != B:
        # Zero-pad input rows only (36 bf16 cols -> cheap). Output rows beyond
        # B are never written: the last output block is clipped by Pallas.
        y2 = jnp.pad(y2, ((0, B_pad - B), (0, 0)))

    out_itemsize = 2 if out_dtype == jnp.bfloat16 else 4
    flops = 2 * B_pad * (nk * hid_p + hid_p * image_size)
    bytes_accessed = (y2.size * 2
                      + w1p.size * 2 + b1p.size * 4
                      + w2p.size * 2 + b2p.size * 4
                      + B * image_size * out_itemsize)

    out = pl.pallas_call(
        _decoder_mlp_kernel,
        out_shape=jax.ShapeDtypeStruct((B, image_size), out_dtype),
        grid_spec=pl.GridSpec(
            grid=(grid_m,),
            in_specs=[
                pl.BlockSpec((tm_eff, nk), lambda i: (i, 0)),        # y tile
                pl.BlockSpec((nk, hid_p), lambda i: (0, 0)),         # W1 (resident)
                pl.BlockSpec((1, hid_p), lambda i: (0, 0)),          # b1
                pl.BlockSpec((hid_p, image_size), lambda i: (0, 0)), # W2 (resident)
                pl.BlockSpec((1, image_size), lambda i: (0, 0)),     # b2
            ],
            out_specs=pl.BlockSpec((tm_eff, image_size), lambda i: (i, 0)),
        ),
        compiler_params=pltpu.CompilerParams(
            dimension_semantics=("parallel",),
        ),
        cost_estimate=pl.CostEstimate(
            flops=flops, transcendentals=0, bytes_accessed=bytes_accessed),
    )(y2, w1p, b1p, w2p, b2p)
    return out


def init_decoder_params(key, N=6, K=6, hidden=300, image_size=784):
    """Deterministic init mimicking PyTorch nn.Linear default (uniform +-1/sqrt(fan_in)).
    Weights returned in (in_features, out_features) layout, float32."""
    k1, k2, k3, k4 = jax.random.split(key, 4)
    nk = N * K
    bound1 = 1.0 / jnp.sqrt(nk)
    bound2 = 1.0 / jnp.sqrt(hidden)
    w1 = jax.random.uniform(k1, (nk, hidden), jnp.float32, -bound1, bound1)
    b1 = jax.random.uniform(k2, (hidden,), jnp.float32, -bound1, bound1)
    w2 = jax.random.uniform(k3, (hidden, image_size), jnp.float32, -bound2, bound2)
    b2 = jax.random.uniform(k4, (image_size,), jnp.float32, -bound2, bound2)
    return w1, b1, w2, b2


def _reference(y, w1, b1, w2, b2, N, K):
    h = jnp.maximum(y.reshape(-1, N * K) @ w1 + b1, 0.0)
    return h @ w2 + b2


if __name__ == "__main__":
    N, K = 6, 6
    hidden, image_size = 300, 784

    key = jax.random.PRNGKey(0)
    kp, ky1, ky2 = jax.random.split(key, 3)
    w1, b1, w2, b2 = init_decoder_params(kp, N=N, K=K, hidden=hidden,
                                         image_size=image_size)

    # Case 1: small batch (tile clamps to the batch, single full-array block).
    B1 = 8
    y1 = jax.random.uniform(ky1, (B1, N, K), jnp.float32)
    out1 = jax.block_until_ready(decoder_forward(y1, w1, b1, w2, b2))
    ref1 = _reference(y1, w1, b1, w2, b2, N, K)
    assert out1.shape == (B1, image_size)
    # bf16 MXU inputs with f32 accumulation -> ~1e-3 relative error vs pure f32
    assert jnp.allclose(out1, ref1, atol=3e-2, rtol=3e-2), "mismatch vs reference (B=8)"

    # Case 2: batch not a multiple of the tile -> multi-step grid, padded input
    # rows, clipped partial last output block.
    B2 = 40
    y2 = jax.random.uniform(ky2, (B2, N, K), jnp.float32)
    out2 = jax.block_until_ready(decoder_forward(y2, w1, b1, w2, b2, tm=16))
    ref2 = _reference(y2, w1, b1, w2, b2, N, K)
    assert out2.shape == (B2, image_size)
    assert jnp.allclose(out2, ref2, atol=3e-2, rtol=3e-2), "mismatch vs reference (B=40)"

    # Case 3: default (large) tile with a medium batch -> exercises the
    # "split into >=2 parallel steps" path used to keep both v7x TCs busy.
    out3 = jax.block_until_ready(decoder_forward(y2, w1, b1, w2, b2))
    assert out3.shape == (B2, image_size)
    assert jnp.allclose(out3, ref2, atol=3e-2, rtol=3e-2), "mismatch vs reference (B=40, default tm)"

    print("KERNEL_OK")
</pallas_src>

<mosaic_0001>
module attributes {stable_mosaic.version = 11 : i64} {
  func.func @_decoder_mlp_kernel(%arg0: i32, %arg1: memref<8x36xbf16, #tpu.memory_space<vmem>>, %arg2: memref<36x384xbf16, #tpu.memory_space<vmem>>, %arg3: memref<1x384xf32, #tpu.memory_space<vmem>>, %arg4: memref<384x784xbf16, #tpu.memory_space<vmem>>, %arg5: memref<1x784xf32, #tpu.memory_space<vmem>>, %arg6: memref<8x784xf32, #tpu.memory_space<vmem>>) attributes {dimension_semantics = [#tpu.dimension_semantics<parallel>], iteration_bounds = array<i64: 1>, scalar_prefetch = 0 : i64, scratch_operands = 0 : i64, tpu.core_type = #tpu.core_type<tc>, window_params = [{transform_indices = @transform_0, window_bounds = array<i64: 8, 36>}, {pipeline_mode = #tpu.pipeline_mode<synchronous>, transform_indices = @transform_1, window_bounds = array<i64: 36, 384>}, {pipeline_mode = #tpu.pipeline_mode<synchronous>, transform_indices = @transform_2, window_bounds = array<i64: 1, 384>}, {pipeline_mode = #tpu.pipeline_mode<synchronous>, transform_indices = @transform_3, window_bounds = array<i64: 384, 784>}, {pipeline_mode = #tpu.pipeline_mode<synchronous>, transform_indices = @transform_4, window_bounds = array<i64: 1, 784>}, {transform_indices = @transform_5, window_bounds = array<i64: 8, 784>}]} {
    %c0 = arith.constant 0 : index
    %c0_0 = arith.constant 0 : index
    %0 = vector.load %arg1[%c0, %c0_0] : memref<8x36xbf16, #tpu.memory_space<vmem>>, vector<8x36xbf16>
    %c0_1 = arith.constant 0 : index
    %c0_2 = arith.constant 0 : index
    %1 = vector.load %arg2[%c0_1, %c0_2] : memref<36x384xbf16, #tpu.memory_space<vmem>>, vector<36x384xbf16>
    %cst = arith.constant dense<0.000000e+00> : vector<8x384xf32>
    %2 = tpu.matmul %0, %1, %cst {dimension_numbers = #tpu.dot_dimension_numbers<[1], [0], [0], [1], [0, 0, 1, 1], [], []>} : vector<8x36xbf16>, vector<36x384xbf16>, vector<8x384xf32> -> vector<8x384xf32>
    %c0_3 = arith.constant 0 : index
    %c0_4 = arith.constant 0 : index
    %3 = vector.load %arg3[%c0_3, %c0_4] : memref<1x384xf32, #tpu.memory_space<vmem>>, vector<1x384xf32>
    %4 = vector.broadcast %3 : vector<1x384xf32> to vector<8x384xf32>
    %5 = arith.addf %2, %4 : vector<8x384xf32>
    %cst_5 = arith.constant 0.000000e+00 : f32
    %6 = vector.broadcast %cst_5 : f32 to vector<8x384xf32>
    %7 = arith.maximumf %5, %6 : vector<8x384xf32>
    %8 = arith.truncf %7 : vector<8x384xf32> to vector<8x384xbf16>
    %c0_6 = arith.constant 0 : index
    %c0_7 = arith.constant 0 : index
    %9 = vector.load %arg4[%c0_6, %c0_7] : memref<384x784xbf16, #tpu.memory_space<vmem>>, vector<384x784xbf16>
    %cst_8 = arith.constant dense<0.000000e+00> : vector<8x784xf32>
    %10 = tpu.matmul %8, %9, %cst_8 {dimension_numbers = #tpu.dot_dimension_numbers<[1], [0], [0], [1], [0, 0, 1, 1], [], []>} : vector<8x384xbf16>, vector<384x784xbf16>, vector<8x784xf32> -> vector<8x784xf32>
    %c0_9 = arith.constant 0 : index
    %c0_10 = arith.constant 0 : index
    %11 = vector.load %arg5[%c0_9, %c0_10] : memref<1x784xf32, #tpu.memory_space<vmem>>, vector<1x784xf32>
    %12 = vector.broadcast %11 : vector<1x784xf32> to vector<8x784xf32>
    %13 = arith.addf %10, %12 : vector<8x784xf32>
    %c0_11 = arith.constant 0 : index
    %c0_12 = arith.constant 0 : index
    %14 = vector.load %arg6[%c0_11, %c0_12] : memref<8x784xf32, #tpu.memory_space<vmem>>, vector<8x784xf32>
    tpu.vector_store %arg6[%c0_11, %c0_12], %13 {strides = array<i32>} : memref<8x784xf32, #tpu.memory_space<vmem>>, vector<8x784xf32>,
    return
  }
  func.func @transform_0(%arg0: i32) -> (i32, i32) {
    %c0_i32 = arith.constant 0 : i32
    %c0_i32_0 = arith.constant 0 : i32
    return %arg0, %c0_i32 : i32, i32
  }
  func.func @transform_1(%arg0: i32) -> (i32, i32) {
    %c0_i32 = arith.constant 0 : i32
    %c0_i32_0 = arith.constant 0 : i32
    %c0_i32_1 = arith.constant 0 : i32
    return %c0_i32, %c0_i32_0 : i32, i32
  }
  func.func @transform_2(%arg0: i32) -> (i32, i32) {
    %c0_i32 = arith.constant 0 : i32
    %c0_i32_0 = arith.constant 0 : i32
    %c0_i32_1 = arith.constant 0 : i32
    return %c0_i32, %c0_i32_0 : i32, i32
  }
  func.func @transform_3(%arg0: i32) -> (i32, i32) {
    %c0_i32 = arith.constant 0 : i32
    %c0_i32_0 = arith.constant 0 : i32
    %c0_i32_1 = arith.constant 0 : i32
    return %c0_i32, %c0_i32_0 : i32, i32
  }
  func.func @transform_4(%arg0: i32) -> (i32, i32) {
    %c0_i32 = arith.constant 0 : i32
    %c0_i32_0 = arith.constant 0 : i32
    %c0_i32_1 = arith.constant 0 : i32
    return %c0_i32, %c0_i32_0 : i32, i32
  }
  func.func @transform_5(%arg0: i32) -> (i32, i32) {
    %c0_i32 = arith.constant 0 : i32
    %c0_i32_0 = arith.constant 0 : i32
    return %arg0, %c0_i32 : i32, i32
  }
}

</mosaic_0001>

<bundles_post_ra>
// kernel: tpu_custom_call.1
= control target key start
LH: loop header
LB: loop body
LE: loop exit
PB: predicated region body
PF: predicated region fallthrough
CT: control target
= control target key end

     0   :  { %v2174_v2 = vmov 0   ;;  %vm94_vm0 = vcmask 1041408   ;;  %vm90_vm1 = vcmask 293888   ;;  %v2175_v14 = vmov 0.0   ;;  %s2820_s0 = inlined_call_operand.vmem [shape: bf16[8,36], index: 0, kind: input, shape index: {}]   ;;  %s2821_s1 = inlined_call_operand.vmem [shape: bf16[36,384], index: 1, kind: input, shape index: {}]   ;;  %s2822_s2 = inlined_call_operand.vmem [shape: f32[1,384], index: 2, kind: input, shape index: {}]   ;;  %s2823_s3 = inlined_call_operand.vmem [shape: bf16[384,784], index: 3, kind: input, shape index: {}]   ;;  %s2824_s4 = inlined_call_operand.vmem [shape: f32[1,784], index: 4, kind: input, shape index: {}]   ;;  %s2825_s5 = inlined_call_operand.hbm [shape: f32[8,784], index: 5, kind: output, shape index: {}]  }
   0x1   :  { %v1899_v0 = vld [vmem:[%s2821_s1 + $0x4] ss:$12 sps:$4 sm:$0xff]   ;;  %v1901_v1 = vld [vmem:[%s2821_s1] ss:$12 sps:$4 sm:$0xff]   ;;  %136 = vmatprep.mubr.bf16.mxu1 %v2174_v2  ;;  %v1902_v3 = vld [vmem:[%s2821_s1 + $0x1c] ss:$12 sps:$4 sm:$0xff]  }
   0x2   :  { %104 = vmatprep.subr.bf16.mxu1 %v1899_v0  ;;  %v31_v4 = vld [vmem:[%s2821_s1 + $0x30] sm:$0x33]  ;;  %v1904_v5 = vld [vmem:[%s2821_s1 + $0x18] ss:$12 sps:$4 sm:$0xff]   ;;  %v1915_v10 = vld [vmem:[%s2823_s3] ss:$28 sps:$4 sm:$0xff]  }
   0x3   :  { %105 = vmatpush1.bf16.msra.mxu1 %v1901_v1  ;;  %v1639_v6 = vcombine.high %v31_v4, %v31_v4  ;;  %v1638_v7 = vcombine.low %v31_v4, %v31_v4  ;;  %v1910_v8 = vld [vmem:[%s2823_s3 + $0x4] ss:$28 sps:$4 sm:$0xff]   ;;  %v1916_v11 = vld [vmem:[%s2823_s3 + $0x3c] ss:$28 sps:$4 sm:$0xff]   ;;  %v1907_v13 = vld [vmem:[%s2821_s1 + $0x8] ss:$12 sps:$4 sm:$0xff]  }
   0x4   :  { %106 = vmatprep.subr.bf16.mxu1 %v1902_v3  ;;  %1284 = vmatprep.subr.bf16.mxu0 %v1910_v8  ;;  %v22_v12 = vld [vmem:[%s2820_s0] sm:$0xf]  ;;  %v1921_v15 = vld [vmem:[%s2823_s3 + $0x38] ss:$28 sps:$4 sm:$0xff]   ;;  %vm2176_vm2 = vmmov 0  }
   0x5   :  { %v96_v9 = vsel %vm94_vm0, %v1638_v7, 0  ;;  %1285 = vmatpush1.bf16.msra.mxu0 %v1915_v10  ;;  %v1922_v16 = vld [vmem:[%s2823_s3 + $0x74] ss:$28 sps:$4 sm:$0xff]   ;;  %v1908_v17 = vld [vmem:[%s2821_s1 + $0x20] ss:$12 sps:$4 sm:$0xff]  }
   0x6   :  { %1286 = vmatprep.subr.bf16.mxu0 %v1916_v11  ;;  %v1909_v18 = vld [vmem:[%s2821_s1 + $0x38] ss:$0 sps:$4 sm:$0x33]   ;;  %v1927_v19 = vld [vmem:[%s2823_s3 + $0x70] ss:$28 sps:$4 sm:$0xff]  }
   0x7   :  { %107 = vmatpush1.bf16.msra.mxu1 %v1904_v5  ;;  %v1928_v20 = vld [vmem:[%s2823_s3 + $0xac] ss:$28 sps:$4 sm:$0xff]   ;;  %v102_v22 = vsel %vm94_vm0, %v1909_v18, 0  ;;  %v1934_v24 = vld [vmem:[%s2823_s3 + $0xe4] ss:$28 sps:$4 sm:$0xff]  }
   0x8   :  { %1641 = vmatprep.subr.msk.bf16.mxu1 %vm94_vm0, %v1639_v6  ;;  %v1914_v21 = vld [vmem:[%s2823_s3 + $0xc] ss:$28 sps:$4 sm:$0xff]   ;;  %v1920_v26 = vld [vmem:[%s2823_s3 + $0x44] ss:$28 sps:$4 sm:$0xff]   ;;  %v1940_v28 = vld [vmem:[%s2823_s3 + $0x11c] ss:$28 sps:$4 sm:$0xff]  }
   0x9   :  { %1287 = vmatpush1.bf16.msra.mxu0 %v1921_v15  ;;  %v1933_v23 = vld [vmem:[%s2823_s3 + $0xa8] ss:$28 sps:$4 sm:$0xff]   ;;  %v1939_v27 = vld [vmem:[%s2823_s3 + $0xe0] ss:$28 sps:$4 sm:$0xff]   ;;  %v1945_v31 = vld [vmem:[%s2823_s3 + $0x118] ss:$28 sps:$4 sm:$0xff]  }
   0xa   :  { %1288 = vmatprep.subr.bf16.mxu0 %v1922_v16  ;;  %v1912_v25 = vld [vmem:[%s2823_s3 + $0x8] ss:$28 sps:$4 sm:$0xff]   ;;  %v1918_v29 = vld [vmem:[%s2823_s3 + $0x40] ss:$28 sps:$4 sm:$0xff]   ;;  %v1946_v32 = vld [vmem:[%s2823_s3 + $0x154] ss:$28 sps:$4 sm:$0xff]  }
   0xb   :  { %109 = vmatpush1.bf16.msra.mxu1 %v96_v9  ;;  %v1926_v30 = vld [vmem:[%s2823_s3 + $0x7c] ss:$28 sps:$4 sm:$0xff]   ;;  %v1932_v34 = vld [vmem:[%s2823_s3 + $0xb4] ss:$28 sps:$4 sm:$0xff]   ;;  %v1952_v36 = vld [vmem:[%s2823_s3 + $0x18c] ss:$28 sps:$4 sm:$0xff]  }
   0xc   :  { %1847 = vmatprep.subr.bf16.mxu1 %v2175_v14  ;;  %v1924_v33 = vld [vmem:[%s2823_s3 + $0x78] ss:$28 sps:$4 sm:$0xff]   ;;  %v1951_v35 = vld [vmem:[%s2823_s3 + $0x150] ss:$28 sps:$4 sm:$0xff]   ;;  %v1957_v39 = vld [vmem:[%s2823_s3 + $0x188] ss:$28 sps:$4 sm:$0xff]  }
   0xd   :  { %1289 = vmatpush1.bf16.msra.mxu0 %v1927_v19  ;;  %v1930_v37 = vld [vmem:[%s2823_s3 + $0xb0] ss:$28 sps:$4 sm:$0xff]   ;;  %v1958_v40 = vld [vmem:[%s2823_s3 + $0x1c4] ss:$28 sps:$4 sm:$0xff]   ;;  %v1964_v44 = vld [vmem:[%s2823_s3 + $0x1fc] ss:$28 sps:$4 sm:$0xff]  }
   0xe   :  { %1642 = vmatmul.mubr.msk.bf16.vlgmr.msra.gmra.mrb[0].mxu1 %vm90_vm1, %v22_v12  ;;  %1290 = vmatprep.subr.bf16.mxu0 %v1928_v20  ;;  %v1938_v38 = vld [vmem:[%s2823_s3 + $0xec] ss:$28 sps:$4 sm:$0xff]   ;;  %v1944_v42 = vld [vmem:[%s2823_s3 + $0x124] ss:$28 sps:$4 sm:$0xff]   ;;  %v1950_v46 = vld [vmem:[%s2823_s3 + $0x15c] ss:$28 sps:$4 sm:$0xff]  }
   0xf   :  { %1848 = vmatpush3.bf16.msra.mxu1 %v1907_v13  ;;  %1853 = vmatprep.mubr.msk.bf16.mxu1 %vm2176_vm2, %v2175_v14  ;;  %v1936_v41 = vld [vmem:[%s2823_s3 + $0xe8] ss:$28 sps:$4 sm:$0xff]   ;;  %v1963_v43 = vld [vmem:[%s2823_s3 + $0x1c0] ss:$28 sps:$4 sm:$0xff]   ;;  %v1969_v47 = vld [vmem:[%s2823_s3 + $0x1f8] ss:$28 sps:$4 sm:$0xff]  }
  0x10   :  { %1849 = vmatprep.subr.bf16.mxu1 %v2175_v14  ;;  %v1942_v45 = vld [vmem:[%s2823_s3 + $0x120] ss:$28 sps:$4 sm:$0xff]   ;;  %v1970_v48 = vld [vmem:[%s2823_s3 + $0x234] ss:$28 sps:$4 sm:$0xff]   ;;  %v1976_v52 = vld [vmem:[%s2823_s3 + $0x26c] ss:$28 sps:$4 sm:$0xff]  }
  0x11   :  { %1291 = vmatpush1.bf16.msra.mxu0 %v1933_v23  ;;  %v1948_v49 = vld [vmem:[%s2823_s3 + $0x158] ss:$28 sps:$4 sm:$0xff]   ;;  %v1975_v51 = vld [vmem:[%s2823_s3 + $0x230] ss:$28 sps:$4 sm:$0xff]   ;;  %v1981_v55 = vld [vmem:[%s2823_s3 + $0x268] ss:$28 sps:$4 sm:$0xff]  }
  0x12   :  { %1292 = vmatprep.subr.bf16.mxu0 %v1934_v24  ;;  %v1956_v50 = vld [vmem:[%s2823_s3 + $0x194] ss:$28 sps:$4 sm:$0xff]   ;;  %v1962_v54 = vld [vmem:[%s2823_s3 + $0x1cc] ss:$28 sps:$4 sm:$0xff]   ;;  %v1982_v56 = vld [vmem:[%s2823_s3 + $0x2a4] ss:$28 sps:$4 sm:$0xff]  }
  0x13   :  { %1850 = vmatpush3.bf16.msra.mxu1 %v1908_v17  ;;  %v1954_v53 = vld [vmem:[%s2823_s3 + $0x190] ss:$28 sps:$4 sm:$0xff]   ;;  %v1960_v57 = vld [vmem:[%s2823_s3 + $0x1c8] ss:$28 sps:$4 sm:$0xff]   ;;  %v1987_v59 = vld [vmem:[%s2823_s3 + $0x2a0] ss:$28 sps:$4 sm:$0xff]  }
  0x14   :  { %1851 = vmatprep.subr.bf16.mxu1 %v2175_v14  ;;  %v1968_v58 = vld [vmem:[%s2823_s3 + $0x204] ss:$28 sps:$4 sm:$0xff]   ;;  %v1988_v60 = vld [vmem:[%s2823_s3 + $0x2dc] ss:$28 sps:$4 sm:$0xff]   ;;  %v1980_v1 = vld [vmem:[%s2823_s3 + $0x274] ss:$28 sps:$4 sm:$0xff]  }
  0x15   :  { %1293 = vmatpush1.bf16.msra.mxu0 %v1939_v27  ;;  %v1966_v61 = vld [vmem:[%s2823_s3 + $0x200] ss:$28 sps:$4 sm:$0xff]   ;;  %v1993_v63 = vld [vmem:[%s2823_s3 + $0x2d8] ss:$28 sps:$4 sm:$0xff]   ;;  %v1978_v3 = vld [vmem:[%s2823_s3 + $0x270] ss:$28 sps:$4 sm:$0xff]  }
  0x16   :  { %1294 = vmatprep.subr.bf16.mxu0 %v1940_v28  ;;  %v1974_v62 = vld [vmem:[%s2823_s3 + $0x23c] ss:$28 sps:$4 sm:$0xff]   ;;  %v1986_v4 = vld [vmem:[%s2823_s3 + $0x2ac] ss:$28 sps:$4 sm:$0xff]   ;;  %v1992_v6 = vld [vmem:[%s2823_s3 + $0x2e4] ss:$28 sps:$4 sm:$0xff]  }
  0x17   :  { %1852 = vmatpush3.bf16.msra.mxu1 %v102_v22  ;;  %v1972_v0 = vld [vmem:[%s2823_s3 + $0x238] ss:$28 sps:$4 sm:$0xff]   ;;  %v1984_v5 = vld [vmem:[%s2823_s3 + $0x2a8] ss:$28 sps:$4 sm:$0xff]   ;;  %v1990_v7 = vld [vmem:[%s2823_s3 + $0x2e0] ss:$28 sps:$4 sm:$0xff]  }
  0x18   :  { %1366 = vmatprep.subr.bf16.mxu1 %v1914_v21 }
  0x19   :  { %1295 = vmatpush1.bf16.msra.mxu0 %v1945_v31 }
  0x1a   :  { %1854 = vmatmul.mubr.msk.bf16.vlgmr.msra.gmra.mrb[4].mxu1 %vm90_vm1, %v22_v12  ;;  %1296 = vmatprep.subr.bf16.mxu0 %v1946_v32 }
  0x1b   :  { %1367 = vmatpush1.bf16.msra.mxu1 %v1912_v25 }
  0x1c   :  { %1368 = vmatprep.subr.bf16.mxu1 %v1920_v26 }
  0x1d   :  { %1297 = vmatpush1.bf16.msra.mxu0 %v1951_v35 }
  0x1e   :  { %1298 = vmatprep.subr.bf16.mxu0 %v1952_v36 }
  0x1f   :  { %1369 = vmatpush1.bf16.msra.mxu1 %v1918_v29 }
  0x20   :  { %1370 = vmatprep.subr.bf16.mxu1 %v1926_v30 }
  0x21   :  { %1299 = vmatpush1.bf16.msra.mxu0 %v1957_v39 }
  0x22   :  { %1300 = vmatprep.subr.bf16.mxu0 %v1958_v40 }
  0x23   :  { %1371 = vmatpush1.bf16.msra.mxu1 %v1924_v33 }
  0x24   :  { %1372 = vmatprep.subr.bf16.mxu1 %v1932_v34 }
  0x25   :  { %1301 = vmatpush1.bf16.msra.mxu0 %v1963_v43 }
  0x26   :  { %1302 = vmatprep.subr.bf16.mxu0 %v1964_v44 }
  0x27   :  { %1373 = vmatpush1.bf16.msra.mxu1 %v1930_v37 }
  0x28   :  { %1374 = vmatprep.subr.bf16.mxu1 %v1938_v38 }
  0x29   :  { %1303 = vmatpush1.bf16.msra.mxu0 %v1969_v47 }
  0x2a   :  { %1304 = vmatprep.subr.bf16.mxu0 %v1970_v48 }
  0x2b   :  { %1375 = vmatpush1.bf16.msra.mxu1 %v1936_v41 }
  0x2c   :  { %1376 = vmatprep.subr.bf16.mxu1 %v1944_v42 }
  0x2d   :  { %1305 = vmatpush1.bf16.msra.mxu0 %v1975_v51 }
  0x2e   :  { %1306 = vmatprep.subr.bf16.mxu0 %v1976_v52 }
  0x2f   :  { %1377 = vmatpush1.bf16.msra.mxu1 %v1942_v45 }
  0x30   :  { %1378 = vmatprep.subr.bf16.mxu1 %v1950_v46 }
  0x31   :  { %1307 = vmatpush1.bf16.msra.mxu0 %v1981_v55 }
  0x32   :  { %1308 = vmatprep.subr.bf16.mxu0 %v1982_v56 }
  0x33   :  { %1379 = vmatpush1.bf16.msra.mxu1 %v1948_v49 }
  0x34   :  { %1380 = vmatprep.subr.bf16.mxu1 %v1956_v50 }
  0x35   :  { %1309 = vmatpush1.bf16.msra.mxu0 %v1987_v59 }
  0x36   :  { %1310 = vmatprep.subr.bf16.mxu0 %v1988_v60 }
  0x37   :  { %1381 = vmatpush1.bf16.msra.mxu1 %v1954_v53 }
  0x38   :  { %1382 = vmatprep.subr.bf16.mxu1 %v1962_v54 }
  0x39   :  { %1311 = vmatpush1.bf16.msra.mxu0 %v1993_v63 }
  0x3b   :  { %1383 = vmatpush1.bf16.msra.mxu1 %v1960_v57 }
  0x3c   :  { %1384 = vmatprep.subr.bf16.mxu1 %v1968_v58 }
  0x3f   :  { %1385 = vmatpush1.bf16.msra.mxu1 %v1966_v61 }
  0x40   :  { %1386 = vmatprep.subr.bf16.mxu1 %v1974_v62 }
  0x43   :  { %1387 = vmatpush1.bf16.msra.mxu1 %v1972_v0 }
  0x44   :  { %1388 = vmatprep.subr.bf16.mxu1 %v1980_v1 }
  0x47   :  { %1389 = vmatpush1.bf16.msra.mxu1 %v1978_v3 }
  0x48   :  { %1390 = vmatprep.subr.bf16.mxu1 %v1986_v4 }
  0x4b   :  { %1391 = vmatpush1.bf16.msra.mxu1 %v1984_v5 }
  0x4c   :  { %1392 = vmatprep.subr.bf16.mxu1 %v1992_v6 }
  0x4f   :  { %1393 = vmatpush1.bf16.msra.mxu1 %v1990_v7 }
  0x50   :  { %10 = vsyncpa [#allocation3], 0  ;;  %v1994_v8 = vld [vmem:[%s2823_s3 + $0x314] ss:$28 sps:$4 sm:$0xff]   ;;  %v1998_v9 = vld [vmem:[%s2823_s3 + $0x31c] ss:$28 sps:$4 sm:$0xff]   ;;  %v35_v19 = vlaneseq }
  0x51   :  { %v1996_v10 = vld [vmem:[%s2823_s3 + $0x318] ss:$28 sps:$4 sm:$0xff]   ;;  %v1999_v11 = vld [vmem:[%s2823_s3 + $0x310] ss:$28 sps:$4 sm:$0xff]   ;;  %1312 = vmatprep.subr.bf16.mxu0 %v1994_v8  ;;  %1394 = vmatprep.subr.bf16.mxu1 %v1998_v9  ;;  %v2005_v16 = vld [vmem:[%s2823_s3 + $0x348] ss:$28 sps:$4 sm:$0xff]  }
  0x52   :  { %1313 = vmatpush1.bf16.msra.mxu0 %v1999_v11  ;;  %v2000_v12 = vld [vmem:[%s2823_s3 + $0x34c] ss:$28 sps:$4 sm:$0xff]   ;;  %v2004_v13 = vld [vmem:[%s2823_s3 + $0x354] ss:$28 sps:$4 sm:$0xff]   ;;  %v2008_v17 = vld [vmem:[%s2823_s3 + $0x384] ss:$28 sps:$4 sm:$0xff]  }
  0x53   :  { %1395 = vmatpush1.bf16.msra.mxu1 %v1996_v10  ;;  %v2002_v15 = vld [vmem:[%s2823_s3 + $0x350] ss:$28 sps:$4 sm:$0xff]   ;;  %1314 = vmatprep.subr.bf16.mxu0 %v2000_v12  ;;  %v2444_v20 = vshrl.u32 %v35_v19, 7  ;;  %v33_v22 = vld [vmem:[%s2822_s2] sm:$0x7]  ;;  %vm1616_vm3 = vcmask 130048  }
  0x54   :  { %1396 = vmatprep.subr.bf16.mxu1 %v2004_v13  ;;  %v2011_v18 = vld [vmem:[%s2823_s3 + $0x38c] ss:$28 sps:$4 sm:$0xff]   ;;  %v2006_v35 = vld [vmem:[%s2823_s3 + $0x380] ss:$28 sps:$4 sm:$0xff]   ;;  %v2012_v40 = vld [vmem:[%s2823_s3 + $0x3b8] ss:$28 sps:$4 sm:$0xff]  }
  0x55   :  { %v37_v21 = vsub.s32 0, %v2444_v20  ;;  %v41_v23 = vsub.s32 1, %v2444_v20  ;;  %v2009_v36 = vld [vmem:[%s2823_s3 + $0x388] ss:$28 sps:$4 sm:$0xff]   ;;  %v2014_v38 = vld [vmem:[%s2823_s3 + $0x3bc] ss:$28 sps:$4 sm:$0xff]  }
  0x56   :  { %1315 = vmatpush1.bf16.msra.mxu0 %v2005_v16  ;;  %v2017_v39 = vld [vmem:[%s2823_s3 + $0x3c4] ss:$28 sps:$4 sm:$0xff]   ;;  %v2020_v42 = vld [vmem:[%s2823_s3 + $0x3f4] ss:$28 sps:$4 sm:$0xff]   ;;  %v2023_v43 = vld [vmem:[%s2823_s3 + $0x3fc] ss:$28 sps:$4 sm:$0xff]  }
  0x57   :  { %1397 = vmatpush1.bf16.msra.mxu1 %v2002_v15  ;;  %1325 = vmatprep.subr.bf16.mxu0 %v2008_v17  ;;  %v38_v24 = vrot.slane %v33_v22, %v37_v21  ;;  %v42_v25 = vrot.slane %v33_v22, %v41_v23  ;;  %v2015_v41 = vld [vmem:[%s2823_s3 + $0x3c0] ss:$28 sps:$4 sm:$0xff]   ;;  %v2018_v46 = vld [vmem:[%s2823_s3 + $0x3f0] ss:$28 sps:$4 sm:$0xff]   ;;  %v2021_v47 = vld [vmem:[%s2823_s3 + $0x3f8] ss:$28 sps:$4 sm:$0xff]  }
  0x58   :  { %1407 = vmatprep.subr.bf16.mxu1 %v2011_v18  ;;  %v2026_v49 = vld [vmem:[%s2823_s3 + $0x42c] ss:$28 sps:$4 sm:$0xff]   ;;  %v2029_v50 = vld [vmem:[%s2823_s3 + $0x434] ss:$28 sps:$4 sm:$0xff]   ;;  %v2032_v54 = vld [vmem:[%s2823_s3 + $0x464] ss:$28 sps:$4 sm:$0xff]  }
  0x59   :  { %v2024_v52 = vld [vmem:[%s2823_s3 + $0x428] ss:$28 sps:$4 sm:$0xff]   ;;  %v2027_v53 = vld [vmem:[%s2823_s3 + $0x430] ss:$28 sps:$4 sm:$0xff]   ;;  %v45_v56 = vsub.s32 2, %v2444_v20 }
  0x5a   :  { %v2035_v55 = vld [vmem:[%s2823_s3 + $0x46c] ss:$28 sps:$4 sm:$0xff]   ;;  %v2030_v57 = vld [vmem:[%s2823_s3 + $0x460] ss:$28 sps:$4 sm:$0xff]   ;;  %v2036_v62 = vld [vmem:[%s2823_s3 + $0x498] ss:$28 sps:$4 sm:$0xff]  }
  0x5b   :  { %v2033_v58 = vld [vmem:[%s2823_s3 + $0x468] ss:$28 sps:$4 sm:$0xff]   ;;  %v2038_v59 = vld [vmem:[%s2823_s3 + $0x49c] ss:$28 sps:$4 sm:$0xff]   ;;  %v46_v61 = vrot.slane %v33_v22, %v45_v56  ;;  %v2044_v0 = vld [vmem:[%s2823_s3 + $0x4d4] ss:$28 sps:$4 sm:$0xff]  }
  0x5c   :  { %v2041_v60 = vld [vmem:[%s2823_s3 + $0x4a4] ss:$28 sps:$4 sm:$0xff]   ;;  %v2047_v1 = vld [vmem:[%s2823_s3 + $0x4dc] ss:$28 sps:$4 sm:$0xff]   ;;  %v2042_v4 = vld [vmem:[%s2823_s3 + $0x4d0] ss:$28 sps:$4 sm:$0xff]  }
  0x5d   :  { %v2039_v63 = vld [vmem:[%s2823_s3 + $0x4a0] ss:$28 sps:$4 sm:$0xff]   ;;  %v2045_v5 = vld [vmem:[%s2823_s3 + $0x4d8] ss:$28 sps:$4 sm:$0xff]   ;;  %v2050_v6 = vld [vmem:[%s2823_s3 + $0x50c] ss:$28 sps:$4 sm:$0xff]  }
  0x5e   :  { %v2053_v7 = vld [vmem:[%s2823_s3 + $0x514] ss:$28 sps:$4 sm:$0xff]   ;;  %v2048_v9 = vld [vmem:[%s2823_s3 + $0x508] ss:$28 sps:$4 sm:$0xff]  }
  0x5f   :  { %v2051_v10 = vld [vmem:[%s2823_s3 + $0x510] ss:$28 sps:$4 sm:$0xff]   ;;  %v2057_v12 = vld [vmem:[%s2823_s3 + $0x1d8] ss:$28 sps:$4 sm:$0xff]   ;;  %v2059_v19 = vld [vmem:[%s2823_s3 + $0x48] ss:$28 sps:$4 sm:$0xff]  }
  0x60   :  { %v2056_v11 = vld [vmem:[%s2823_s3 + $0x14] ss:$28 sps:$4 sm:$0xff]   ;;  %v2061_v17 = vld [vmem:[%s2823_s3 + $0x4c] ss:$28 sps:$4 sm:$0xff]  }
  0x61   :  { %v2054_v15 = vld [vmem:[%s2823_s3 + $0x10] ss:$28 sps:$4 sm:$0xff]   ;;  %v2058_v16 = vld [vmem:[%s2823_s3 + $0x18] ss:$28 sps:$4 sm:$0xff]  }
  0x62   :  { %v2062_v18 = vld [vmem:[%s2823_s3 + $0x210] ss:$28 sps:$4 sm:$0xff]  }
  0x63   :  { %v2063_v22 = vld [vmem:[%s2823_s3 + $0x50] ss:$28 sps:$4 sm:$0xff]  }
  0xe1   :  { %v138_v26 = vpop.f32.mrb[0].mxu1 }
  0xe2   :  { %v139_v27 = vadd.f32 %v138_v26, %v38_v24  ;;  %v140_v28 = vpop.f32.mrb[1].mxu1  ;;  %v2066_v24 = vld [vmem:[%s2823_s3 + $0x84] ss:$28 sps:$4 sm:$0xff]  }
  0xe3   :  { %v141_v29 = vadd.f32 %v140_v28, %v42_v25  ;;  %v142_v30 = vpop.f32.mrb[2].mxu1  ;;  %v2067_v25 = vld [vmem:[%s2823_s3 + $0x248] ss:$28 sps:$4 sm:$0xff]   ;;  %v2064_v26 = vld [vmem:[%s2823_s3 + $0x80] ss:$28 sps:$4 sm:$0xff]  }
  0xe4   :  { %v185_v31 = vmax.f32 %v139_v27, 0.0  ;;  %v143_v32 = vpop.f32.mrb[3].mxu1  ;;  %v2068_v27 = vld [vmem:[%s2823_s3 + $0x88] ss:$28 sps:$4 sm:$0xff]   ;;  %v2071_v28 = vld [vmem:[%s2823_s3 + $0xbc] ss:$28 sps:$4 sm:$0xff]  }
  0xe5   :  { %v186_v33 = vmax.f32 %v141_v29, 0.0  ;;  %v2072_v29 = vld [vmem:[%s2823_s3 + $0x280] ss:$28 sps:$4 sm:$0xff]   ;;  %v2069_v30 = vld [vmem:[%s2823_s3 + $0xb8] ss:$28 sps:$4 sm:$0xff]  }
  0xe6   :  { %v2463_v37 = vpack.c.bf16 %v185_v31, %v185_v31  ;;  %v2073_v31 = vld [vmem:[%s2823_s3 + $0xc0] ss:$28 sps:$4 sm:$0xff]   ;;  %v2076_v32 = vld [vmem:[%s2823_s3 + $0xf4] ss:$28 sps:$4 sm:$0xff]  }
  0xe7   :  { %v2455_v34 = vpack.c.bf16 %v186_v33, %v186_v33  ;;  %v2077_v33 = vld [vmem:[%s2823_s3 + $0x2b8] ss:$28 sps:$4 sm:$0xff]  }
  0xe9   :  { %1316 = vmatprep.mubr.bf16.mxu0 %v2455_v34  ;;  %1398 = vmatprep.mubr.bf16.mxu1 %v2455_v34 }
  0xea   :  { %1317 = vmatmul.mubr.bf16.vlgmr.msra.gmra.mrb[0].mxu0 %v2463_v37  ;;  %1399 = vmatmul.mubr.bf16.vlgmr.msra.gmra.mrb[8].mxu1 %v2463_v37 }
  0xeb   :  { %1326 = vmatpush1.bf16.msra.mxu0 %v2006_v35  ;;  %1408 = vmatpush1.bf16.msra.mxu1 %v2009_v36  ;;  %v2078_v35 = vld [vmem:[%s2823_s3 + $0xf8] ss:$28 sps:$4 sm:$0xff]   ;;  %v2081_v36 = vld [vmem:[%s2823_s3 + $0x12c] ss:$28 sps:$4 sm:$0xff]  }
  0xec   :  { %1327 = vmatprep.subr.bf16.mxu0 %v2014_v38  ;;  %1409 = vmatprep.subr.bf16.mxu1 %v2017_v39  ;;  %v2082_v38 = vld [vmem:[%s2823_s3 + $0x2f0] ss:$28 sps:$4 sm:$0xff]   ;;  %v2079_v39 = vld [vmem:[%s2823_s3 + $0x128] ss:$28 sps:$4 sm:$0xff]  }
  0xed   :  { %v179_v44 = vpop.f32.mrb[4].mxu1  ;;  %1357 = vmatprep.mubr.bf16.mxu0 %v2174_v2  ;;  %1439 = vmatprep.mubr.bf16.mxu1 %v2174_v2 }
  0xee   :  { %v1855_v45 = vpop.f32.mrb[5].mxu1  ;;  %v180_v3 = vadd.f32 %v179_v44, %v46_v61  ;;  %v2088_v44 = vld [vmem:[%s2823_s3 + $0x168] ss:$28 sps:$4 sm:$0xff]   ;;  %v2109_v61 = vld [vmem:[%s2823_s3 + $0x440] ss:$28 sps:$4 sm:$0xff]  }
  0xef   :  { %1328 = vmatpush1.bf16.msra.mxu0 %v2012_v40  ;;  %1410 = vmatpush1.bf16.msra.mxu1 %v2015_v41  ;;  %v182_v48 = vpop.f32.mrb[6].mxu1  ;;  %v2083_v40 = vld [vmem:[%s2823_s3 + $0x130] ss:$28 sps:$4 sm:$0xff]   ;;  %v2086_v41 = vld [vmem:[%s2823_s3 + $0x164] ss:$28 sps:$4 sm:$0xff]  }
  0xf0   :  { %1329 = vmatprep.subr.bf16.mxu0 %v2020_v42  ;;  %1411 = vmatprep.subr.bf16.mxu1 %v2023_v43  ;;  %v1856_v51 = vpop.f32.mrb[7].mxu1  ;;  %v187_v8 = vmax.f32 %v180_v3, 0.0  ;;  %v2087_v42 = vld [vmem:[%s2823_s3 + $0x328] ss:$28 sps:$4 sm:$0xff]   ;;  %v2084_v43 = vld [vmem:[%s2823_s3 + $0x160] ss:$28 sps:$4 sm:$0xff]  }
  0xf1   :  { %v2091_v45 = vld [vmem:[%s2823_s3 + $0x19c] ss:$28 sps:$4 sm:$0xff]   ;;  %v2114_v3 = vld [vmem:[%s2823_s3 + $0x2e8] ss:$28 sps:$4 sm:$0xff]  }
  0xf2   :  { %v2564_v13 = vpack.c.bf16 %v187_v8, %v187_v8  ;;  %v2093_v48 = vld [vmem:[%s2823_s3 + $0x1a0] ss:$28 sps:$4 sm:$0xff]   ;;  %v2097_v51 = vld [vmem:[%s2823_s3 + $0x398] ss:$28 sps:$4 sm:$0xff]  }
  0xf3   :  { %1330 = vmatpush1.bf16.msra.mxu0 %v2018_v46  ;;  %1412 = vmatpush1.bf16.msra.mxu1 %v2021_v47  ;;  %v2092_v46 = vld [vmem:[%s2823_s3 + $0x360] ss:$28 sps:$4 sm:$0xff]   ;;  %v2089_v47 = vld [vmem:[%s2823_s3 + $0x198] ss:$28 sps:$4 sm:$0xff]  }
  0xf4   :  { %1331 = vmatprep.subr.bf16.mxu0 %v2026_v49  ;;  %1413 = vmatprep.subr.bf16.mxu1 %v2029_v50  ;;  %v2096_v49 = vld [vmem:[%s2823_s3 + $0x1d4] ss:$28 sps:$4 sm:$0xff]   ;;  %v2124_v8 = vld [vmem:[%s2823_s3 + $0x35c] ss:$28 sps:$4 sm:$0xff]  }
  0xf5   :  { %v2094_v50 = vld [vmem:[%s2823_s3 + $0x1d0] ss:$28 sps:$4 sm:$0xff]  }
  0xf7   :  { %1332 = vmatpush1.bf16.msra.mxu0 %v2024_v52  ;;  %1414 = vmatpush1.bf16.msra.mxu1 %v2027_v53  ;;  %v2100_v52 = vld [vmem:[%s2823_s3 + $0x20c] ss:$28 sps:$4 sm:$0xff]  }
  0xf8   :  { %1333 = vmatprep.subr.bf16.mxu0 %v2032_v54  ;;  %1415 = vmatprep.subr.bf16.mxu1 %v2035_v55  ;;  %v2098_v53 = vld [vmem:[%s2823_s3 + $0x208] ss:$28 sps:$4 sm:$0xff]   ;;  %v2101_v54 = vld [vmem:[%s2823_s3 + $0x3d0] ss:$28 sps:$4 sm:$0xff]  }
  0xf9   :  { %v2104_v55 = vld [vmem:[%s2823_s3 + $0x244] ss:$28 sps:$4 sm:$0xff]  }
  0xfb   :  { %1334 = vmatpush1.bf16.msra.mxu0 %v2030_v57  ;;  %1416 = vmatpush1.bf16.msra.mxu1 %v2033_v58  ;;  %v2102_v57 = vld [vmem:[%s2823_s3 + $0x240] ss:$28 sps:$4 sm:$0xff]   ;;  %v2105_v58 = vld [vmem:[%s2823_s3 + $0x408] ss:$28 sps:$4 sm:$0xff]  }
  0xfc   :  { %1335 = vmatprep.subr.bf16.mxu0 %v2038_v59  ;;  %1417 = vmatprep.subr.bf16.mxu1 %v2041_v60  ;;  %v2108_v59 = vld [vmem:[%s2823_s3 + $0x27c] ss:$28 sps:$4 sm:$0xff]  }
  0xfd   :  { %v2106_v60 = vld [vmem:[%s2823_s3 + $0x278] ss:$28 sps:$4 sm:$0xff]  }
  0xff   :  { %1336 = vmatpush1.bf16.msra.mxu0 %v2036_v62  ;;  %1418 = vmatpush1.bf16.msra.mxu1 %v2039_v63  ;;  %v2112_v62 = vld [vmem:[%s2823_s3 + $0x2b4] ss:$28 sps:$4 sm:$0xff]  }
 0x100   :  { %1337 = vmatprep.subr.bf16.mxu0 %v2044_v0  ;;  %1419 = vmatprep.subr.bf16.mxu1 %v2047_v1  ;;  %v2110_v63 = vld [vmem:[%s2823_s3 + $0x2b0] ss:$28 sps:$4 sm:$0xff]   ;;  %v2113_v0 = vld [vmem:[%s2823_s3 + $0x478] ss:$28 sps:$4 sm:$0xff]  }
 0x101   :  { %v2116_v1 = vld [vmem:[%s2823_s3 + $0x2ec] ss:$28 sps:$4 sm:$0xff]  }
 0x103   :  { %1338 = vmatpush1.bf16.msra.mxu0 %v2042_v4  ;;  %1420 = vmatpush1.bf16.msra.mxu1 %v2045_v5  ;;  %v2117_v4 = vld [vmem:[%s2823_s3 + $0x4b0] ss:$28 sps:$4 sm:$0xff]   ;;  %v2120_v5 = vld [vmem:[%s2823_s3 + $0x324] ss:$28 sps:$4 sm:$0xff]  }
 0x104   :  { %1339 = vmatprep.subr.bf16.mxu0 %v2050_v6  ;;  %1421 = vmatprep.subr.bf16.mxu1 %v2053_v7  ;;  %v2118_v6 = vld [vmem:[%s2823_s3 + $0x320] ss:$28 sps:$4 sm:$0xff]   ;;  %v2121_v7 = vld [vmem:[%s2823_s3 + $0x4e8] ss:$28 sps:$4 sm:$0xff]  }
 0x107   :  { %1340 = vmatpush1.bf16.msra.mxu0 %v2048_v9  ;;  %1422 = vmatpush1.bf16.msra.mxu1 %v2051_v10  ;;  %v2122_v9 = vld [vmem:[%s2823_s3 + $0x358] ss:$28 sps:$4 sm:$0xff]   ;;  %v2125_v10 = vld [vmem:[%s2823_s3 + $0x520] ss:$28 sps:$4 sm:$0xff]  }
 0x108   :  { %1448 = vmatprep.subr.bf16.mxu0 %v2056_v11  ;;  %1816 = vmatprep.subr.bf16.mxu1 %v2057_v12  ;;  %v2128_v11 = vld [vmem:[%s2823_s3 + $0x394] ss:$28 sps:$4 sm:$0xff]  }
 0x109   :  { %v2126_v12 = vld [vmem:[%s2823_s3 + $0x390] ss:$28 sps:$4 sm:$0xff]  }
 0x10a   :  { %1358 = vmatmul.mubr.bf16.vlgmr.msra.gmra.mrb[0].mxu0 %v2564_v13  ;;  %1440 = vmatmul.mubr.bf16.vlgmr.msra.gmra.mrb[8].mxu1 %v2564_v13 }
 0x10b   :  { %1449 = vmatpush1.bf16.msra.mxu0 %v2054_v15  ;;  %1480 = vmatprep.mubr.bf16.mxu0 %v2455_v34  ;;  %v2131_v15 = vld [vmem:[%s2823_s3 + $0x3cc] ss:$28 sps:$4 sm:$0xff]  }
 0x10c   :  { %1817 = vmatpush3.bf16.msra.mxu1 %v2058_v16  ;;  %1562 = vmatprep.mubr.bf16.mxu1 %v2455_v34  ;;  %v2074_v34 = vld [vmem:[%s2823_s3 + $0xf0] ss:$28 sps:$4 sm:$0xff]   ;;  %v2134_v16 = vld [vmem:[%s2823_s3 + $0x404] ss:$28 sps:$4 sm:$0xff]  }
 0x10d   :  { %1450 = vmatprep.subr.bf16.mxu0 %v2061_v17  ;;  %1818 = vmatprep.subr.bf16.mxu1 %v2062_v18  ;;  %v2132_v17 = vld [vmem:[%s2823_s3 + $0x400] ss:$28 sps:$4 sm:$0xff]   ;;  %v2135_v18 = vld [vmem:[%s2823_s3 + $0x438] ss:$28 sps:$4 sm:$0xff]  }
 0x10f   :  { %1451 = vmatpush1.bf16.msra.mxu0 %v2059_v19  ;;  %v2138_v19 = vld [vmem:[%s2823_s3 + $0x470] ss:$28 sps:$4 sm:$0xff]  }
 0x110   :  { %1819 = vmatpush3.bf16.msra.mxu1 %v2063_v22  ;;  %1452 = vmatprep.subr.bf16.mxu0 %v2066_v24  ;;  %v2143_v22 = vld [vmem:[%s2823_s3 + $0x4ac] ss:$28 sps:$4 sm:$0xff]  }
 0x111   :  { %1820 = vmatprep.subr.bf16.mxu1 %v2067_v25  ;;  %v2141_v24 = vld [vmem:[%s2823_s3 + $0x4a8] ss:$28 sps:$4 sm:$0xff]  }
 0x112   :  { %v2146_v25 = vld [vmem:[%s2823_s3 + $0x4e4] ss:$28 sps:$4 sm:$0xff]  }
 0x113   :  { %1453 = vmatpush1.bf16.msra.mxu0 %v2064_v26  ;;  %v2144_v26 = vld [vmem:[%s2823_s3 + $0x4e0] ss:$28 sps:$4 sm:$0xff]  }
 0x114   :  { %1821 = vmatpush3.bf16.msra.mxu1 %v2068_v27  ;;  %1454 = vmatprep.subr.bf16.mxu0 %v2071_v28  ;;  %v2149_v27 = vld [vmem:[%s2823_s3 + $0x51c] ss:$28 sps:$4 sm:$0xff]  }
 0x115   :  { %1822 = vmatprep.subr.bf16.mxu1 %v2072_v29  ;;  %v2147_v28 = vld [vmem:[%s2823_s3 + $0x518] ss:$28 sps:$4 sm:$0xff]   ;;  %v383_v29 = vld [vmem:[%s2824_s4] sm:$0x7f] }
 0x117   :  { %1455 = vmatpush1.bf16.msra.mxu0 %v2069_v30  ;;  %v399_v30 = vsub.s32 3, %v2444_v20 }
 0x118   :  { %1823 = vmatpush3.bf16.msra.mxu1 %v2073_v31  ;;  %1456 = vmatprep.subr.bf16.mxu0 %v2076_v32  ;;  %v388_v31 = vrot.slane %v383_v29, %v37_v21  ;;  %v396_v32 = vrot.slane %v383_v29, %v45_v56 }
 0x119   :  { %1824 = vmatprep.subr.bf16.mxu1 %v2077_v33  ;;  %v392_v33 = vrot.slane %v383_v29, %v41_v23 }
 0x11b   :  { %1457 = vmatpush1.bf16.msra.mxu0 %v2074_v34  ;;  %v400_v34 = vrot.slane %v383_v29, %v399_v30 }
 0x11c   :  { %1825 = vmatpush3.bf16.msra.mxu1 %v2078_v35  ;;  %1458 = vmatprep.subr.bf16.mxu0 %v2081_v36 }
 0x11d   :  { %1826 = vmatprep.subr.bf16.mxu1 %v2082_v38 }
 0x11f   :  { %1459 = vmatpush1.bf16.msra.mxu0 %v2079_v39 }
 0x120   :  { %1827 = vmatpush3.bf16.msra.mxu1 %v2083_v40  ;;  %1460 = vmatprep.subr.bf16.mxu0 %v2086_v41 }
 0x121   :  { %1828 = vmatprep.subr.bf16.mxu1 %v2087_v42 }
 0x123   :  { %1461 = vmatpush1.bf16.msra.mxu0 %v2084_v43 }
 0x124   :  { %1829 = vmatpush3.bf16.msra.mxu1 %v2088_v44  ;;  %1462 = vmatprep.subr.bf16.mxu0 %v2091_v45 }
 0x125   :  { %1830 = vmatprep.subr.bf16.mxu1 %v2092_v46 }
 0x127   :  { %1463 = vmatpush1.bf16.msra.mxu0 %v2089_v47 }
 0x128   :  { %1831 = vmatpush3.bf16.msra.mxu1 %v2093_v48  ;;  %1464 = vmatprep.subr.bf16.mxu0 %v2096_v49  ;;  %v411_v49 = vsub.s32 6, %v2444_v20 }
 0x129   :  { %1857 = vmatprep.subr.bf16.mxu1 %v2175_v14 }
 0x12b   :  { %1563 = vmatmul.mubr.bf16.vlgmr.msra.gmra.mrb[12].mxu1 %v2463_v37  ;;  %1465 = vmatpush1.bf16.msra.mxu0 %v2094_v50  ;;  %v412_v50 = vrot.slane %v383_v29, %v411_v49 }
 0x12c   :  { %1858 = vmatpush3.bf16.msra.mxu1 %v2097_v51  ;;  %1466 = vmatprep.subr.bf16.mxu0 %v2100_v52 }
 0x12d   :  { %1859 = vmatprep.subr.bf16.mxu1 %v2175_v14  ;;  %1873 = vmatprep.mubr.msk.bf16.mxu1 %vm2176_vm2, %v2175_v14 }
 0x12f   :  { %1467 = vmatpush1.bf16.msra.mxu0 %v2098_v53 }
 0x130   :  { %1860 = vmatpush3.bf16.msra.mxu1 %v2101_v54  ;;  %1468 = vmatprep.subr.bf16.mxu0 %v2104_v55 }
 0x131   :  { %1861 = vmatprep.subr.bf16.mxu1 %v2175_v14 }
 0x133   :  { %1469 = vmatpush1.bf16.msra.mxu0 %v2102_v57 }
 0x134   :  { %1862 = vmatpush3.bf16.msra.mxu1 %v2105_v58  ;;  %1470 = vmatprep.subr.bf16.mxu0 %v2108_v59  ;;  %v403_v58 = vsub.s32 4, %v2444_v20  ;;  %v407_v59 = vsub.s32 5, %v2444_v20 }
 0x135   :  { %1863 = vmatprep.subr.bf16.mxu1 %v2175_v14 }
 0x137   :  { %1471 = vmatpush1.bf16.msra.mxu0 %v2106_v60  ;;  %v404_v60 = vrot.slane %v383_v29, %v403_v58 }
 0x138   :  { %1864 = vmatpush3.bf16.msra.mxu1 %v2109_v61  ;;  %1472 = vmatprep.subr.bf16.mxu0 %v2112_v62  ;;  %v408_v61 = vrot.slane %v383_v29, %v407_v59 }
 0x139   :  { %1865 = vmatprep.subr.bf16.mxu1 %v2175_v14 }
 0x13b   :  { %1473 = vmatpush1.bf16.msra.mxu0 %v2110_v63 }
 0x13c   :  { %1866 = vmatpush3.bf16.msra.mxu1 %v2113_v0  ;;  %1474 = vmatprep.subr.bf16.mxu0 %v2116_v1 }
 0x13d   :  { %1867 = vmatprep.subr.bf16.mxu1 %v2175_v14 }
 0x13f   :  { %1475 = vmatpush1.bf16.msra.mxu0 %v2114_v3 }
 0x140   :  { %1868 = vmatpush3.bf16.msra.mxu1 %v2117_v4  ;;  %1476 = vmatprep.subr.bf16.mxu0 %v2120_v5 }
 0x141   :  { %1869 = vmatprep.subr.bf16.mxu1 %v2175_v14 }
 0x143   :  { %1477 = vmatpush1.bf16.msra.mxu0 %v2118_v6 }
 0x144   :  { %1870 = vmatpush3.bf16.msra.mxu1 %v2121_v7  ;;  %1478 = vmatprep.subr.bf16.mxu0 %v2124_v8 }
 0x145   :  { %1871 = vmatprep.subr.bf16.mxu1 %v2175_v14  ;;  %v2129_v14 = vld [vmem:[%s2823_s3 + $0x3c8] ss:$28 sps:$4 sm:$0xff]  }
 0x147   :  { %1479 = vmatpush1.bf16.msra.mxu0 %v2122_v9 }
 0x148   :  { %1872 = vmatpush3.bf16.msra.mxu1 %v2125_v10  ;;  %1489 = vmatprep.subr.bf16.mxu0 %v2128_v11 }
 0x14a   :  { %1481 = vmatmul.mubr.bf16.vlgmr.msra.gmra.mrb[4].mxu0 %v2463_v37  ;;  %v2137_v37 = vld [vmem:[%s2823_s3 + $0x43c] ss:$28 sps:$4 sm:$0xff]  }
 0x14b   :  { %1874 = vmatmul.mubr.bf16.vlgmr.msra.gmra.mrb[16].mxu1 %v2564_v13  ;;  %1490 = vmatpush1.bf16.msra.mxu0 %v2126_v12 }
 0x14c   :  { %1491 = vmatprep.subr.bf16.mxu0 %v2131_v15  ;;  %1521 = vmatprep.mubr.bf16.mxu0 %v2174_v2  ;;  %v2140_v2 = vld [vmem:[%s2823_s3 + $0x474] ss:$28 sps:$4 sm:$0xff]   ;;  %s2177_s3 = smov [#allocation2]  }
 0x14d   :  { %s1624_s4 = sshll.u32 %s2177_s3, 4  ;;  %s1625_s4 = int_to_ptr.vmem [resolvable:$true] %s1624_s4 }
 0x14e   :  { %s2150_s18 = scalar_lea.vmem %s1625_s4, 896  ;;  %p2155_p1 = scmp.lt.s32.totalorder %s1625_s4, %s1625_s4 }
 0x14f   :  { %1492 = vmatpush1.bf16.msra.mxu0 %v2129_v14  ;;  %p2151_p0 = scmp.ne.s32.totalorder %s1625_s4, %s2150_s18  ;;  %p2156_p2 = scmp.lt.s32.totalorder %s2150_s18, %s2150_s18 }
 0x150   :  { %1493 = vmatprep.subr.bf16.mxu0 %v2134_v16 }
 0x151   :  { %p2157_p3 = por %p2156_p2, %p2155_p1 }
 0x153   :  { %1494 = vmatpush1.bf16.msra.mxu0 %v2132_v17  ;;  %p2158_p4 = pnand %p2157_p3, %p2151_p0 }
 0x154   :  { %1495 = vmatprep.subr.bf16.mxu0 %v2137_v37 }
 0x157   :  { %1496 = vmatpush1.bf16.msra.mxu0 %v2135_v18 }
 0x158   :  { %1497 = vmatprep.subr.bf16.mxu0 %v2140_v2 }
 0x15b   :  { %1498 = vmatpush1.bf16.msra.mxu0 %v2138_v19 }
 0x15c   :  { %1499 = vmatprep.subr.bf16.mxu0 %v2143_v22 }
 0x15f   :  { %1500 = vmatpush1.bf16.msra.mxu0 %v2141_v24 }
 0x160   :  { %1501 = vmatprep.subr.bf16.mxu0 %v2146_v25 }
 0x163   :  { %1502 = vmatpush1.bf16.msra.mxu0 %v2144_v26 }
 0x164   :  { %1503 = vmatprep.subr.bf16.mxu0 %v2149_v27 }
 0x167   :  { %1504 = vmatpush1.bf16.msra.mxu0 %v2147_v28 }
 0x16a   :  { %1522 = vmatmul.mubr.bf16.vlgmr.msra.gmra.mrb[4].mxu0 %v2564_v13 }
 0x1dd   :  { %v1359_v35 = vpop.f32.mrb[0].mxu0  ;;  %v1441_v36 = vpop.f32.mrb[8].mxu1 }
 0x1de   :  { %v1877_v38 = vadd.f32 %v1359_v35, %v388_v31  ;;  %v1879_v13 = vadd.f32 %v1441_v36, %v396_v32  ;;  %v1361_v39 = vpop.f32.mrb[1].mxu0  ;;  %v1443_v40 = vpop.f32.mrb[9].mxu1 }
 0x1df   :  { %v1878_v41 = vadd.f32 %v1361_v39, %v392_v33  ;;  %v1880_v42 = vadd.f32 %v1443_v40, %v400_v34  ;;  %v1363_v43 = vpop.f32.mrb[2].mxu0  ;;  %v1445_v44 = vpop.f32.mrb[10].mxu1 }
 0x1e0   :  { %1610 = vst [vmem:[#allocation2] sm:$0xff] %v1877_v38  ;;  %1612 = vst [vmem:[#allocation2 + $0x10] sm:$0xff] %v1879_v13  ;;  %v1364_v21 = vpop.f32.mrb[3].mxu0  ;;  %v1446_v45 = vpop.f32.mrb[11].mxu1 }
 0x1e1   :  { %1611 = vst [vmem:[#allocation2 + $0x8] sm:$0xff] %v1878_v41  ;;  %1613 = vst [vmem:[#allocation2 + $0x18] sm:$0xff] %v1880_v42 }
 0x1fe   :  { %v1832_v56 = vpop.f32.mrb[12].mxu1 }
 0x1ff   :  { %v1833_v46 = vpop.f32.mrb[13].mxu1 }
 0x200   :  { %v1834_v23 = vadd.f32 %v1833_v46, %v1832_v56  ;;  %v1835_v47 = vpop.f32.mrb[14].mxu1 }
 0x201   :  { %v1836_v48 = vpop.f32.mrb[15].mxu1 }
 0x202   :  { %v1565_v51 = vadd.f32 %v1834_v23, %v412_v50 }
 0x21e   :  { %v1604_v52 = vpop.f32.mrb[16].mxu1 }
 0x21f   :  { %v1605_v53 = vadd.f32 %v1604_v52, %v1565_v51  ;;  %v1875_v54 = vpop.f32.mrb[17].mxu1 }
 0x220   :  { %v1607_v55 = vpop.f32.mrb[18].mxu1 }
 0x221   :  { %1617 = vst.msk [vmem:[#allocation2 + $0x30] sm:$0xff] %vm1616_vm3, %v1605_v53  ;;  %v1876_v57 = vpop.f32.mrb[19].mxu1 }
 0x23d   :  { %v1523_v62 = vpop.f32.mrb[4].mxu0 }
 0x23e   :  { %v1881_v63 = vadd.f32 %v1523_v62, %v404_v60  ;;  %v1525_v0 = vpop.f32.mrb[5].mxu0 }
 0x23f   :  { %v1882_v1 = vadd.f32 %v1525_v0, %v408_v61  ;;  %v1527_v3 = vpop.f32.mrb[6].mxu0 }
 0x240   :  { %1614 = vst [vmem:[#allocation2 + $0x20] sm:$0xff] %v1881_v63  ;;  %v1528_v4 = vpop.f32.mrb[7].mxu0 }
 0x241   :  { %1615 = vst [vmem:[#allocation2 + $0x28] sm:$0xff] %v1882_v1 }
 0x242   :  { %2161 = shalt.err (!%p2158_p4)
}
 0x243   :  { %s2162_s21 = scalar_lea.hbm %s2825_s5, 896 }
 0x244   :  { %p2163_p5 = scmp.ne.s32.totalorder %s2825_s5, %s2162_s21  ;;  %p2166_p6 = scmp.lt.u32.totalorder %s2162_s21, %s2825_s5 }
 0x246   :  { %p2168_p7 = pnand %p2166_p6, %p2163_p5 }
 0x248   :  { %2171 = shalt.err (!%p2168_p7)
}
 0x249   :  { %1627 = dma.vmem_to_hbm [thread:$0]  %s1625_s4, 896, %s2825_s5, [#allocation3]  }
 0x24a   :  { %2172 = dma.done.wait [#allocation3], 896  }
 0x24b   :  { %2173 = vsyncadd [#allocation3], 4294966400 }
 0x24c   :  { %1631 = vsyncpa [#allocation3], 1 }

</bundles_post_ra>
